<compile_context>
chip_gen: v5e
topology: v5e:2x2
jax: 0.10.0
libtpu: 0.0.40
codegen_flags: <defaults>
</compile_context>

<pallas_src>
import math
from functools import partial

import jax
import jax.numpy as jnp
from jax import lax
from jax.experimental import pallas as pl
from jax.experimental.pallas import tpu as pltpu


def _flash_attend_kernel(q_ref, k_ref, v_ref, o_ref,
                         qs_ref, m_ref, l_ref, acc_ref,
                         *, scale, approx_recip):
    """One (batch, head-block, q-tile, kv-tile) step of online-softmax attention."""
    ki = pl.program_id(3)

    @pl.when(ki == 0)
    def _init():
        # Scale q once per q tile (the q block is resident across the kv axis).
        qs_ref[...] = (q_ref[0] * scale).astype(qs_ref.dtype)
        m_ref[...] = jnp.full_like(m_ref, -jnp.inf)
        l_ref[...] = jnp.zeros_like(l_ref)
        acc_ref[...] = jnp.zeros_like(acc_ref)

    q = qs_ref[...]            # (hb, tq, D), native dtype, pre-scaled
    k = k_ref[0]               # (hb, tk, D)
    v = v_ref[0]               # (hb, tk, D)

    # s[h, i, j] = sum_d q[h, i, d] * k[h, j, d]  -- no explicit k transpose.
    s = lax.dot_general(
        q, k,
        dimension_numbers=(((2,), (2,)), ((0,), (0,))),
        preferred_element_type=jnp.float32,
    )  # (hb, tq, tk) f32

    m_prev = m_ref[...]
    m_new = jnp.maximum(m_prev, jnp.max(s, axis=-1, keepdims=True))
    alpha = jnp.exp(m_prev - m_new)
    p = jnp.exp(s - m_new)                                   # (hb, tq, tk) f32
    l_ref[...] = alpha * l_ref[...] + jnp.sum(p, axis=-1, keepdims=True)

    pv = lax.dot_general(
        p.astype(v.dtype), v,
        dimension_numbers=(((2,), (1,)), ((0,), (0,))),
        preferred_element_type=jnp.float32,
    )  # (hb, tq, D) f32
    acc_ref[...] = alpha * acc_ref[...] + pv
    m_ref[...] = m_new

    @pl.when(ki == pl.num_programs(3) - 1)
    def _finalize():
        inv_l = pl.reciprocal(l_ref[...], approx=approx_recip)   # (hb, tq, 1)
        out = acc_ref[...] * inv_l                               # (hb, tq, D) f32
        hb = out.shape[0]
        if hb == 1:
            merged = out[0]
        else:
            # Assemble a lane-dense (tq, hb*D) slab -> one unmasked store.
            merged = jnp.concatenate([out[h] for h in range(hb)], axis=-1)
        o_ref[0, 0] = merged.astype(o_ref.dtype)


def _vmem_capacity_bytes():
    """Per-core VMEM capacity; generation-aware fallback if the query fails."""
    try:
        cap = getattr(pltpu.get_tpu_info(), "vmem_capacity_bytes", None)
        if cap:
            return int(cap)
    except Exception:
        pass
    kind = ""
    try:
        kind = jax.devices()[0].device_kind.lower()
    except Exception:
        pass
    if "v5" in kind or "v6" in kind:
        return 128 * 1024 * 1024
    return 64 * 1024 * 1024      # conservative (v7x: 64 MiB per TensorCore)


def _is_v5():
    try:
        return "v5" in jax.devices()[0].device_kind.lower()
    except Exception:
        return False


def _pick_seq_tile(s, target, mult):
    """Largest divisor of s that is <= target and a multiple of mult, else s (full dim)."""
    cap = min(target, s)
    for cand in range(cap, 0, -1):
        if s % cand == 0 and cand % mult == 0:
            return cand
    return s


def _pick_head_block(H, D, tq, tk, q_tiles, B, itemsize, *, budget, score_cap):
    """Smallest head block giving a lane-dense (>=128) merged output, clamped by a
    VMEM budget that includes the f32 score/prob intermediate, a score-tile cap
    (vreg pressure), and a >=2-parallel-grid-unit requirement (dual-TC v7x)."""
    divisors = [h for h in range(1, H + 1) if H % h == 0]
    preferred = next((h for h in divisors if h * D >= 128), H)

    def vmem_cost(hb):
        blocks = 2 * itemsize * hb * (2 * tq * D + 2 * tk * D)    # q,o + k,v (double-buffered)
        scratch = 4 * hb * tq * (D + 2) + itemsize * hb * tq * D  # f32 acc,m,l + scaled-q
        score = (4 + itemsize) * hb * tq * tk                     # f32 s/p + p cast for MXU
        return blocks + scratch + score

    for hb in sorted(divisors, reverse=True):
        if hb > preferred:
            continue
        if 4 * hb * tq * tk > score_cap:          # f32 score tile (vreg/spill cap)
            continue
        if vmem_cost(hb) > budget:
            continue
        if hb > 1 and B * (H // hb) * q_tiles < 2:
            continue                              # keep both TensorCores busy (v7x)
        return hb
    return 1


def attend(q, k, v, *, tq=None, tk=None, hb=None):
    """Scaled dot-product attention, equivalent to Attend.forward(q, k, v)."""
    assert q.ndim == 4 and k.ndim == 4 and v.ndim == 4
    B, H, Sq, D = q.shape
    Bk, Hk, Skv, Dk = k.shape
    assert (B, H, D) == (Bk, Hk, Dk) and v.shape == k.shape   # cross-attention allowed
    assert q.dtype == k.dtype == v.dtype

    dtype = q.dtype
    itemsize = jnp.dtype(dtype).itemsize
    scale = 1.0 / math.sqrt(D)
    approx_recip = itemsize < 4          # exact normalization for f32 outputs

    vmem_cap = _vmem_capacity_bytes()
    big_vmem = vmem_cap >= 100 * 1024 * 1024       # v5e / v5p / v6e (128 MiB)
    sublane_mult = 8 * max(1, 4 // itemsize)       # 8 (f32), 16 (bf16), 32 (int8/fp8)

    # Tile targets: large tq reduces K/V re-streaming; tk >= 256 fills the
    # 256-wide MXU on v6e/v7x, while 128 already saturates v5e's 128-wide MXU.
    tq_target = 256 if big_vmem else 128
    tk_target = 128 if _is_v5() else 256

    if tq is None:
        tq = _pick_seq_tile(Sq, tq_target, sublane_mult)
    if tk is None:
        tk = _pick_seq_tile(Skv, tk_target, sublane_mult)
    assert Sq % tq == 0 and Skv % tk == 0

    if hb is None:
        hb = _pick_head_block(
            H, D, tq, tk, Sq // tq, B, itemsize,
            budget=vmem_cap // 6,
            score_cap=(2 << 20) if big_vmem else (1 << 20),
        )
    assert H % hb == 0

    grid = (B, H // hb, Sq // tq, Skv // tk)

    q_spec = pl.BlockSpec((1, hb, tq, D), lambda b, h, qi, ki: (b, h, qi, 0))
    kv_spec = pl.BlockSpec((1, hb, tk, D), lambda b, h, qi, ki: (b, h, ki, 0))
    # Kernel output merges the head block into the lane dim (hb*D >= 128 when
    # possible) so the finalize store and the writeback DMA are lane-dense.
    o_spec = pl.BlockSpec((1, 1, tq, hb * D), lambda b, h, qi, ki: (b, h, qi, 0))

    # TODO(synk): for decode-style shapes on v5e, pipeline_mode=pl.Buffered(3)
    # on kv_spec would hide more of the K/V stream; omitted for portability.

    cost = pl.CostEstimate(
        flops=4 * B * H * Sq * Skv * D,
        transcendentals=B * H * Sq * Skv,
        bytes_accessed=itemsize * (q.size + k.size + v.size + B * H * Sq * D),
    )

    out = pl.pallas_call(
        partial(_flash_attend_kernel, scale=scale, approx_recip=approx_recip),
        out_shape=jax.ShapeDtypeStruct((B, H // hb, Sq, hb * D), dtype),
        grid_spec=pltpu.PrefetchScalarGridSpec(
            num_scalar_prefetch=0,
            grid=grid,
            in_specs=[q_spec, kv_spec, kv_spec],
            out_specs=o_spec,
            scratch_shapes=[
                pltpu.VMEM((hb, tq, D), dtype),         # pre-scaled q (native dtype)
                pltpu.VMEM((hb, tq, 1), jnp.float32),   # running max m
                pltpu.VMEM((hb, tq, 1), jnp.float32),   # running denominator l
                pltpu.VMEM((hb, tq, D), jnp.float32),   # output accumulator
            ],
        ),
        compiler_params=pltpu.CompilerParams(
            dimension_semantics=("parallel", "parallel", "parallel", "arbitrary"),
            vmem_limit_bytes=min(96 * 1024 * 1024, (vmem_cap * 3) // 4),
        ),
        cost_estimate=cost,
    )(q, k, v)

    # Wrapper-side layout plumbing back to the PyTorch (B, H, Sq, D) layout.
    out = out.reshape(B, H // hb, Sq, hb, D)
    out = jnp.transpose(out, (0, 1, 3, 2, 4))
    return out.reshape(B, H, Sq, D)


def _reference_attend(q, k, v):
    scale = 1.0 / math.sqrt(q.shape[-1])
    s = jnp.einsum("bhqd,bhkd->bhqk", q, k) * scale
    p = jax.nn.softmax(s, axis=-1)
    return jnp.einsum("bhqk,bhkd->bhqd", p, v)


if __name__ == "__main__":
    key = jax.random.PRNGKey(0)
    k1, k2, k3, k4, k5, k6 = jax.random.split(key, 6)

    # Small shapes implied by multi-head attention usage: (B, H, S, D).
    B, H, S, D = 2, 4, 8, 32
    q = jax.random.normal(k1, (B, H, S, D), dtype=jnp.float32)
    kk = jax.random.normal(k2, (B, H, S, D), dtype=jnp.float32)
    vv = jax.random.normal(k3, (B, H, S, D), dtype=jnp.float32)

    out = attend(q, kk, vv)
    jax.block_until_ready(out)
    ref = _reference_attend(q, kk, vv)
    assert out.shape == (B, H, S, D)
    assert jnp.allclose(out, ref, atol=5e-3, rtol=5e-3), "f32 mismatch vs reference"

    # Larger bf16 case exercising the multi-tile online-softmax (flash) path.
    B2, H2, S2, D2 = 1, 2, 256, 64
    q2 = jax.random.normal(k4, (B2, H2, S2, D2), dtype=jnp.bfloat16)
    k2_ = jax.random.normal(k5, (B2, H2, S2, D2), dtype=jnp.bfloat16)
    v2 = jax.random.normal(k6, (B2, H2, S2, D2), dtype=jnp.bfloat16)

    out2 = attend(q2, k2_, v2, tq=64, tk=64)
    jax.block_until_ready(out2)
    ref2 = _reference_attend(q2.astype(jnp.float32), k2_.astype(jnp.float32),
                             v2.astype(jnp.float32))
    err = jnp.max(jnp.abs(out2.astype(jnp.float32) - ref2))
    assert err < 5e-2, f"bf16 mismatch vs reference (max err {err})"

    print("KERNEL_OK")
</pallas_src>

<mosaic_0001>
module attributes {stable_mosaic.version = 11 : i64} {
  func.func @_flash_attend_kernel(%arg0: i32, %arg1: i32, %arg2: i32, %arg3: i32, %arg4: memref<1x4x8x32xf32, #tpu.memory_space<vmem>>, %arg5: memref<1x4x8x32xf32, #tpu.memory_space<vmem>>, %arg6: memref<1x4x8x32xf32, #tpu.memory_space<vmem>>, %arg7: memref<1x1x8x128xf32, #tpu.memory_space<vmem>>, %arg8: memref<4x8x32xf32, #tpu.memory_space<vmem>>, %arg9: memref<4x8x1xf32, #tpu.memory_space<vmem>>, %arg10: memref<4x8x1xf32, #tpu.memory_space<vmem>>, %arg11: memref<4x8x32xf32, #tpu.memory_space<vmem>>) attributes {dimension_semantics = [#tpu.dimension_semantics<parallel>, #tpu.dimension_semantics<parallel>, #tpu.dimension_semantics<parallel>, #tpu.dimension_semantics<arbitrary>], iteration_bounds = array<i64: 2, 1, 1, 1>, scalar_prefetch = 0 : i64, scratch_operands = 4 : i64, tpu.core_type = #tpu.core_type<tc>, window_params = [{transform_indices = @transform_0, window_bounds = array<i64: 1, 4, 8, 32>}, {transform_indices = @transform_1, window_bounds = array<i64: 1, 4, 8, 32>}, {transform_indices = @transform_2, window_bounds = array<i64: 1, 4, 8, 32>}, {transform_indices = @transform_3, window_bounds = array<i64: 1, 1, 8, 128>}]} {
    %c0_i32 = arith.constant 0 : i32
    %0 = arith.cmpi eq, %arg3, %c0_i32 : i32
    %1 = arith.extui %0 : i1 to i32
    %c0_i32_0 = arith.constant 0 : i32
    %2 = arith.cmpi ne, %1, %c0_i32_0 : i32
    scf.if %2 {
      %c0_34 = arith.constant 0 : index
      %c0_35 = arith.constant 0 : index
      %c0_36 = arith.constant 0 : index
      %c0_37 = arith.constant 0 : index
      %34 = vector.load %arg4[%c0_34, %c0_35, %c0_36, %c0_37] : memref<1x4x8x32xf32, #tpu.memory_space<vmem>>, vector<1x4x8x32xf32>
      %35 = vector.shape_cast %34 : vector<1x4x8x32xf32> to vector<4x8x32xf32>
      %cst_38 = arith.constant 0.176776692 : f32
      %36 = vector.broadcast %cst_38 : f32 to vector<4x8x32xf32>
      %37 = arith.mulf %35, %36 : vector<4x8x32xf32>
      %c0_39 = arith.constant 0 : index
      %c0_40 = arith.constant 0 : index
      %c0_41 = arith.constant 0 : index
      %38 = vector.load %arg8[%c0_39, %c0_40, %c0_41] : memref<4x8x32xf32, #tpu.memory_space<vmem>>, vector<4x8x32xf32>
      tpu.vector_store %arg8[%c0_39, %c0_40, %c0_41], %37 {strides = array<i32>} : memref<4x8x32xf32, #tpu.memory_space<vmem>>, vector<4x8x32xf32>,
      %cst_42 = arith.constant 0xFF800000 : f32
      %39 = vector.broadcast %cst_42 : f32 to vector<4x8x1xf32>
      %c0_43 = arith.constant 0 : index
      %c0_44 = arith.constant 0 : index
      %c0_45 = arith.constant 0 : index
      %40 = vector.load %arg9[%c0_43, %c0_44, %c0_45] : memref<4x8x1xf32, #tpu.memory_space<vmem>>, vector<4x8x1xf32>
      tpu.vector_store %arg9[%c0_43, %c0_44, %c0_45], %39 {strides = array<i32>} : memref<4x8x1xf32, #tpu.memory_space<vmem>>, vector<4x8x1xf32>,
      %cst_46 = arith.constant 0.000000e+00 : f32
      %41 = vector.broadcast %cst_46 : f32 to vector<4x8x1xf32>
      %c0_47 = arith.constant 0 : index
      %c0_48 = arith.constant 0 : index
      %c0_49 = arith.constant 0 : index
      %42 = vector.load %arg10[%c0_47, %c0_48, %c0_49] : memref<4x8x1xf32, #tpu.memory_space<vmem>>, vector<4x8x1xf32>
      tpu.vector_store %arg10[%c0_47, %c0_48, %c0_49], %41 {strides = array<i32>} : memref<4x8x1xf32, #tpu.memory_space<vmem>>, vector<4x8x1xf32>,
      %cst_50 = arith.constant 0.000000e+00 : f32
      %43 = vector.broadcast %cst_50 : f32 to vector<4x8x32xf32>
      %c0_51 = arith.constant 0 : index
      %c0_52 = arith.constant 0 : index
      %c0_53 = arith.constant 0 : index
      %44 = vector.load %arg11[%c0_51, %c0_52, %c0_53] : memref<4x8x32xf32, #tpu.memory_space<vmem>>, vector<4x8x32xf32>
      tpu.vector_store %arg11[%c0_51, %c0_52, %c0_53], %43 {strides = array<i32>} : memref<4x8x32xf32, #tpu.memory_space<vmem>>, vector<4x8x32xf32>,
    } else {
    }
    %c0 = arith.constant 0 : index
    %c0_1 = arith.constant 0 : index
    %c0_2 = arith.constant 0 : index
    %3 = vector.load %arg8[%c0, %c0_1, %c0_2] : memref<4x8x32xf32, #tpu.memory_space<vmem>>, vector<4x8x32xf32>
    %c0_3 = arith.constant 0 : index
    %c0_4 = arith.constant 0 : index
    %c0_5 = arith.constant 0 : index
    %c0_6 = arith.constant 0 : index
    %4 = vector.load %arg5[%c0_3, %c0_4, %c0_5, %c0_6] : memref<1x4x8x32xf32, #tpu.memory_space<vmem>>, vector<1x4x8x32xf32>
    %5 = vector.shape_cast %4 : vector<1x4x8x32xf32> to vector<4x8x32xf32>
    %c0_7 = arith.constant 0 : index
    %c0_8 = arith.constant 0 : index
    %c0_9 = arith.constant 0 : index
    %c0_10 = arith.constant 0 : index
    %6 = vector.load %arg6[%c0_7, %c0_8, %c0_9, %c0_10] : memref<1x4x8x32xf32, #tpu.memory_space<vmem>>, vector<1x4x8x32xf32>
    %7 = vector.shape_cast %6 : vector<1x4x8x32xf32> to vector<4x8x32xf32>
    %cst = arith.constant dense<0.000000e+00> : vector<4x8x8xf32>
    %8 = tpu.matmul %3, %5, %cst {dimension_numbers = #tpu.dot_dimension_numbers<[2], [2], [1], [1], [0, 0, 0, 1, 1, 1], [0], [0]>} : vector<4x8x32xf32>, vector<4x8x32xf32>, vector<4x8x8xf32> -> vector<4x8x8xf32>
    %c0_11 = arith.constant 0 : index
    %c0_12 = arith.constant 0 : index
    %c0_13 = arith.constant 0 : index
    %9 = vector.load %arg9[%c0_11, %c0_12, %c0_13] : memref<4x8x1xf32, #tpu.memory_space<vmem>>, vector<4x8x1xf32>
    %cst_14 = arith.constant dense<0xFF800000> : vector<4x8xf32>
    %10 = vector.multi_reduction <maximumf>, %8, %cst_14 [2] : vector<4x8x8xf32> to vector<4x8xf32>
    %11 = vector.shape_cast %10 : vector<4x8xf32> to vector<4x8x1xf32>
    %12 = arith.maximumf %9, %11 : vector<4x8x1xf32>
    %13 = arith.subf %9, %12 : vector<4x8x1xf32>
    %14 = math.exp %13 : vector<4x8x1xf32>
    %15 = vector.broadcast %12 : vector<4x8x1xf32> to vector<4x8x8xf32>
    %16 = arith.subf %8, %15 : vector<4x8x8xf32>
    %17 = math.exp %16 : vector<4x8x8xf32>
    %c0_15 = arith.constant 0 : index
    %c0_16 = arith.constant 0 : index
    %c0_17 = arith.constant 0 : index
    %18 = vector.load %arg10[%c0_15, %c0_16, %c0_17] : memref<4x8x1xf32, #tpu.memory_space<vmem>>, vector<4x8x1xf32>
    %19 = arith.mulf %14, %18 : vector<4x8x1xf32>
    %cst_18 = arith.constant dense<0.000000e+00> : vector<4x8xf32>
    %20 = vector.multi_reduction <add>, %17, %cst_18 [2] : vector<4x8x8xf32> to vector<4x8xf32>
    %21 = vector.shape_cast %20 : vector<4x8xf32> to vector<4x8x1xf32>
    %22 = arith.addf %19, %21 : vector<4x8x1xf32>
    %c0_19 = arith.constant 0 : index
    %c0_20 = arith.constant 0 : index
    %c0_21 = arith.constant 0 : index
    %23 = vector.load %arg10[%c0_19, %c0_20, %c0_21] : memref<4x8x1xf32, #tpu.memory_space<vmem>>, vector<4x8x1xf32>
    tpu.vector_store %arg10[%c0_19, %c0_20, %c0_21], %22 {strides = array<i32>} : memref<4x8x1xf32, #tpu.memory_space<vmem>>, vector<4x8x1xf32>,
    %cst_22 = arith.constant dense<0.000000e+00> : vector<4x8x32xf32>
    %24 = tpu.matmul %17, %7, %cst_22 {dimension_numbers = #tpu.dot_dimension_numbers<[2], [1], [1], [2], [0, 0, 0, 1, 1, 2], [0], [0]>} : vector<4x8x8xf32>, vector<4x8x32xf32>, vector<4x8x32xf32> -> vector<4x8x32xf32>
    %c0_23 = arith.constant 0 : index
    %c0_24 = arith.constant 0 : index
    %c0_25 = arith.constant 0 : index
    %25 = vector.load %arg11[%c0_23, %c0_24, %c0_25] : memref<4x8x32xf32, #tpu.memory_space<vmem>>, vector<4x8x32xf32>
    %26 = vector.broadcast %14 : vector<4x8x1xf32> to vector<4x8x32xf32>
    %27 = arith.mulf %26, %25 : vector<4x8x32xf32>
    %28 = arith.addf %27, %24 : vector<4x8x32xf32>
    %c0_26 = arith.constant 0 : index
    %c0_27 = arith.constant 0 : index
    %c0_28 = arith.constant 0 : index
    %29 = vector.load %arg11[%c0_26, %c0_27, %c0_28] : memref<4x8x32xf32, #tpu.memory_space<vmem>>, vector<4x8x32xf32>
    tpu.vector_store %arg11[%c0_26, %c0_27, %c0_28], %28 {strides = array<i32>} : memref<4x8x32xf32, #tpu.memory_space<vmem>>, vector<4x8x32xf32>,
    %c0_29 = arith.constant 0 : index
    %c0_30 = arith.constant 0 : index
    %c0_31 = arith.constant 0 : index
    %30 = vector.load %arg9[%c0_29, %c0_30, %c0_31] : memref<4x8x1xf32, #tpu.memory_space<vmem>>, vector<4x8x1xf32>
    tpu.vector_store %arg9[%c0_29, %c0_30, %c0_31], %12 {strides = array<i32>} : memref<4x8x1xf32, #tpu.memory_space<vmem>>, vector<4x8x1xf32>,
    %c0_i32_32 = arith.constant 0 : i32
    %31 = arith.cmpi eq, %arg3, %c0_i32_32 : i32
    %32 = arith.extui %31 : i1 to i32
    %c0_i32_33 = arith.constant 0 : i32
    %33 = arith.cmpi ne, %32, %c0_i32_33 : i32
    scf.if %33 {
      %c0_34 = arith.constant 0 : index
      %c0_35 = arith.constant 0 : index
      %c0_36 = arith.constant 0 : index
      %34 = vector.load %arg10[%c0_34, %c0_35, %c0_36] : memref<4x8x1xf32, #tpu.memory_space<vmem>>, vector<4x8x1xf32>
      %35 = tpu.reciprocal %34 : vector<4x8x1xf32> -> vector<4x8x1xf32>
      %c0_37 = arith.constant 0 : index
      %c0_38 = arith.constant 0 : index
      %c0_39 = arith.constant 0 : index
      %36 = vector.load %arg11[%c0_37, %c0_38, %c0_39] : memref<4x8x32xf32, #tpu.memory_space<vmem>>, vector<4x8x32xf32>
      %37 = vector.broadcast %35 : vector<4x8x1xf32> to vector<4x8x32xf32>
      %38 = arith.mulf %36, %37 : vector<4x8x32xf32>
      %39 = vector.extract_strided_slice %38 {offsets = [0, 0, 0], sizes = [1, 8, 32], strides = [1, 1, 1]} : vector<4x8x32xf32> to vector<1x8x32xf32>
      %40 = vector.shape_cast %39 : vector<1x8x32xf32> to vector<8x32xf32>
      %41 = vector.extract_strided_slice %38 {offsets = [1, 0, 0], sizes = [1, 8, 32], strides = [1, 1, 1]} : vector<4x8x32xf32> to vector<1x8x32xf32>
      %42 = vector.shape_cast %41 : vector<1x8x32xf32> to vector<8x32xf32>
      %43 = vector.extract_strided_slice %38 {offsets = [2, 0, 0], sizes = [1, 8, 32], strides = [1, 1, 1]} : vector<4x8x32xf32> to vector<1x8x32xf32>
      %44 = vector.shape_cast %43 : vector<1x8x32xf32> to vector<8x32xf32>
      %45 = vector.extract_strided_slice %38 {offsets = [3, 0, 0], sizes = [1, 8, 32], strides = [1, 1, 1]} : vector<4x8x32xf32> to vector<1x8x32xf32>
      %46 = vector.shape_cast %45 : vector<1x8x32xf32> to vector<8x32xf32>
      %47 = tpu.concatenate %40, %42, %44, %46 in 1 : vector<8x32xf32>, vector<8x32xf32>, vector<8x32xf32>, vector<8x32xf32> -> vector<8x128xf32>
      %c0_40 = arith.constant 0 : index
      %c0_41 = arith.constant 0 : index
      %c0_42 = arith.constant 0 : index
      %c0_43 = arith.constant 0 : index
      %48 = vector.load %arg7[%c0_40, %c0_41, %c0_42, %c0_43] : memref<1x1x8x128xf32, #tpu.memory_space<vmem>>, vector<1x1x8x128xf32>
      %49 = vector.shape_cast %48 : vector<1x1x8x128xf32> to vector<8x128xf32>
      %50 = vector.shape_cast %47 : vector<8x128xf32> to vector<1x1x8x128xf32>
      tpu.vector_store %arg7[%c0_40, %c0_41, %c0_42, %c0_43], %50 {strides = array<i32>} : memref<1x1x8x128xf32, #tpu.memory_space<vmem>>, vector<1x1x8x128xf32>,
    } else {
    }
    return
  }
  func.func @transform_0(%arg0: i32, %arg1: i32, %arg2: i32, %arg3: i32) -> (i32, i32, i32, i32) {
    %c0_i32 = arith.constant 0 : i32
    %c0_i32_0 = arith.constant 0 : i32
    return %arg0, %arg1, %arg2, %c0_i32 : i32, i32, i32, i32
  }
  func.func @transform_1(%arg0: i32, %arg1: i32, %arg2: i32, %arg3: i32) -> (i32, i32, i32, i32) {
    %c0_i32 = arith.constant 0 : i32
    %c0_i32_0 = arith.constant 0 : i32
    return %arg0, %arg1, %arg3, %c0_i32 : i32, i32, i32, i32
  }
  func.func @transform_2(%arg0: i32, %arg1: i32, %arg2: i32, %arg3: i32) -> (i32, i32, i32, i32) {
    %c0_i32 = arith.constant 0 : i32
    %c0_i32_0 = arith.constant 0 : i32
    return %arg0, %arg1, %arg3, %c0_i32 : i32, i32, i32, i32
  }
  func.func @transform_3(%arg0: i32, %arg1: i32, %arg2: i32, %arg3: i32) -> (i32, i32, i32, i32) {
    %c0_i32 = arith.constant 0 : i32
    %c0_i32_0 = arith.constant 0 : i32
    return %arg0, %arg1, %arg2, %c0_i32 : i32, i32, i32, i32
  }
}

</mosaic_0001>

<bundles_post_ra>
// kernel: tpu_custom_call.1
= control target key start
LH: loop header
LB: loop body
LE: loop exit
PB: predicated region body
PF: predicated region fallthrough
CT: control target
= control target key end

     0   :  { %s1561_s0 = inlined_call_operand.hbm [shape: f32[2,4,8,32], index: 0, kind: input, shape index: {}]   ;;  %s1562_s1 = inlined_call_operand.hbm [shape: f32[2,4,8,32], index: 1, kind: input, shape index: {}]   ;;  %s1563_s2 = inlined_call_operand.hbm [shape: f32[2,4,8,32], index: 2, kind: input, shape index: {}]   ;;  %s1564_s3 = inlined_call_operand.hbm [shape: f32[2,1,8,128], index: 3, kind: output, shape index: {}]  }
   0x1   :  { %1570 = sst [smem:[#allocation21_spill]] %s1562_s1 }
   0x2   :  { %8 = vsyncpa [#allocation7], 0 }
   0x3   :  { %10 = vsyncpa [#allocation7 + $0x1], 0 }
   0x4   :  { %11 = vsyncpa [#allocation10], 0 }
   0x5   :  { %13 = vsyncpa [#allocation10 + $0x1], 0 }
   0x6   :  { %14 = vsyncpa [#allocation8], 0 }
   0x7   :  { %16 = vsyncpa [#allocation8 + $0x1], 0  ;;  %s1317_s12 = smov 0   ;;  %s1319_s13 = smov 0  }
   0x8   :  { %s1321_s14 = smov 0   ;;  %s1323_s15 = smov 0  }
   0x9   :  { %s1325_s16 = smov 0   ;;  %s1327_s17 = smov 0  }
   0xa LB: > { %1571 = sst [smem:[#allocation16_spill]] %s1275_s14  ;;  %s1348_s18 = sadd.s32 4294967295, %s1287_s17   ;;  %s1287_s17 = sphi %s1327_s17, %s22_s17   ;;  %s1283_s16 = sphi %s1325_s16, %s1587_s16   ;;  %s1279_s15 = sphi %s1323_s15, %s1586_s15   ;;  %s1275_s14 = sphi %s1321_s14, %s1585_s14   ;;  %s1271_s13 = sphi %s1319_s13, %s1589_s13   ;;  %s1267_s12 = sphi %s1317_s12, %s1588_s12  }
   0xb   : > { %1572 = sst [smem:[#allocation17_spill]] %s1283_s16  ;;  %s968_s19 = sadd.s32 4294967294, %s1287_s17  }
   0xc   : > { %1573 = sst [smem:[#allocation18_spill]] %s1287_s17  ;;  %s48_s20 = sadd.s32 1, %s1283_s16 }
   0xd   : > { %s59_s21 = sadd.s32 1, %s1275_s14  ;;  %p50_p0 = scmp.ge.s32.totalorder %s48_s20, 2 }
   0xe   : > { %p66_p1 = scmp.ne.s32.totalorder %s1275_s14, %s1271_s13  ;;  %p67_p2 = scmp.eq.s32.totalorder %s1287_s17, 0 }
   0xf   : > { %p72_p3 = scmp.ne.s32.totalorder %s1271_s13, %s1267_s12  ;;  %s1591_s20 = smov (%p50_p0, %s48_s20), 0 }
  0x10   : > { %1574 = sst [smem:[#allocation19_spill]] %s1591_s20  ;;  %p1360_p4 = por %p67_p2, %p66_p1 }
  0x11   : > { %p73_p5 = scmp.eq.s32.totalorder %s1348_s18, 0  ;;  %s52_s23 = ssub.s32 %s1283_s16, %s1591_s20 }
  0x12   : > { %p160_p6 = scmp.eq.s32.totalorder %s1348_s18, 1  ;;  %p57_p7 = scmp.eq.s32.totalorder %s52_s23, 0 }
  0x13   : > { %p1368_p8 = por %p73_p5, %p72_p3  ;;  %p166_p10 = scmp.eq.s32.totalorder %s968_s19, 1 }
  0x14   : > { %p1372_p9 = por %p160_p6, %p66_p1  ;;  %p970_p12 = scmp.ge.s32.totalorder %s1287_s17, 2 }
  0x15   : > { %s1377_s26 = scalar_select %p57_p7, %s1275_s14, %s59_s21  }
  0x16   : > { %p1379_p11 = por %p166_p10, %p72_p3  ;;  %p1026_p13 = scmp.lt.s32.totalorder %s1287_s17, 2 }
  0x17   : > { %1578 = sst [smem:[#allocation20_spill]] %s1377_s26  ;;  %s186_s28 = sand.u32 1, %s1275_s14  }
  0x18   : > { %s1386_s29 = sshll.u32 %s186_s28, 5  ;;  %s1001_s30 = sshll.u32 %s1283_s16, 5 }
  0x19   : > { %p1391_p0 = pnand %p1026_p13, %p1360_p4  ;;  %s211_s5 = sand.u32 1, %s1287_s17  }
  0x1a   : > { %s1581_s1 = sld [smem:[#allocation21_spill]]  ;;  %s215_s10 = scalar_lea.vmem [#allocation9], %s1386_s29 }
  0x1b   : > { %s226_s11 = sshll.u32 %s215_s10, 4  ;;  %s212_s19 = scalar_lea.sflag [#allocation10], %s211_s5  ;;  %s227_s11 = int_to_ptr.vmem [resolvable:$true] %s226_s11 }
  0x1c   : > { %s1289_s21 = smov 128   ;;  %s1290_s22 = smov 8  }
  0x1d   : > { %p980_p1 = scmp.ge.s32.totalorder %s1287_s17, 1  ;;  %p259_p2 = scmp.lt.s32.totalorder %s1287_s17, 3 }
  0x1e   : > { %s187_s5 = scalar_lea.sflag [#allocation7], %s186_s28  ;;  %s248_s16 = scalar_lea.hbm %s1563_s2, %s1001_s30 }
  0x1f   : > { %p1404_p3 = pnand %p980_p1, %p259_p2  ;;  %s249_s26 = sshll.u32 %s248_s16, 4  ;;  %s250_s26 = int_to_ptr.hbm [resolvable:$true] %s249_s26 }
  0x20   : > { %s223_s8 = scalar_lea.hbm %s1581_s1, %s1001_s30  ;;  %s190_s1 = scalar_lea.vmem [#allocation6], %s1386_s29 }
  0x21   : > { %s224_s9 = sshll.u32 %s223_s8, 4  ;;  %s198_s8 = scalar_lea.hbm %s1561_s0, %s1001_s30  ;;  %s225_s9 = int_to_ptr.hbm [resolvable:$true] %s224_s9 }
  0x22   : > { %1018 = dma.hbm_to_vmem [thread:$0]  (!%p1391_p0), %s225_s9, 512, %s227_s11, %s212_s19, %s1289_s21, %s1289_s21, %s1290_s22  }
  0x23   : > { %s199_s10 = sshll.u32 %s198_s8, 4  ;;  %s201_s20 = sshll.u32 %s190_s1, 4  ;;  %s200_s10 = int_to_ptr.hbm [resolvable:$true] %s199_s10  ;;  %s202_s20 = int_to_ptr.vmem [resolvable:$true] %s201_s20 }
  0x24   : > { %1015 = dma.hbm_to_vmem [thread:$0]  (!%p1391_p0), %s200_s10, 512, %s202_s20, %s187_s5, %s1289_s21, %s1289_s21, %s1290_s22  }
  0x25   : > { %s240_s14 = scalar_lea.vmem [#allocation11], %s1386_s29  ;;  %263 = sbr.rel (%p1404_p3) target bundleno = 876 (0x36c), region = 32 }
  0x26   : > { %s251_s17 = sshll.u32 %s240_s14, 4  ;;  %s1423_s1 = sand.u32 (!%p1404_p3), 1, %s1271_s13   ;;  %s252_s17 = int_to_ptr.vmem [resolvable:$true] %s251_s17 }
  0x27   : > { %1021 = dma.hbm_to_vmem [thread:$0]  (!%p1391_p0), %s250_s26, 512, %s252_s17, %s212_s19, %s1289_s21, %s1289_s21, %s1290_s22  }
  0x28   : > { %s1426_s20 = sshll.u32 (!%p1404_p3), %s1423_s1, 5  ;;  %s266_s28 = scalar_lea.sflag (!%p1404_p3), [#allocation7], %s1423_s1 }
  0x29   : > { %s1430_s16 = scalar_lea.vmem (!%p1404_p3), [#allocation6], %s1426_s20 }
  0x2a   : > { %1254 = dma.done.wait (%p1368_p8), %s266_s28, 512  }
  0x2b   : > { %1256 = vsyncadd (%p1368_p8), %s266_s28, 4294966784  ;;  %s275_s14 = sand.u32 1, %s1348_s18   ;;  %s279_s26 = scalar_lea.vmem [#allocation9], %s1426_s20 }
  0x2c   : > { %s276_s17 = scalar_lea.sflag [#allocation10], %s275_s14 }
  0x2d   : > { %1258 = dma.done.wait (%p1368_p8), %s276_s17, 1024  }
  0x2e   : > { %1260 = vsyncadd (%p1368_p8), %s276_s17, 4294966272  ;;  %vm338_vm0 = vcmask 261120   ;;  %v361_v0 = vld [vmem:[%s279_s26 + $0x8] sm:$0xff]  ;;  %v362_v1 = vld [vmem:[%s279_s26 + $0x10] sm:$0xff]  ;;  %vm343_vm1 = vcmask 7168   ;;  %v1291_v15 = vmov -inf  }
  0x2f   : > { %v331_v2 = vld [vmem:[%s1430_s16 + $0x8] sm:$0xff]  ;;  %987 = vmatpush.xpose.msk.msra.mxu1 %vm338_vm0, %v361_v0  ;;  %989 = vmatpush.xpose.msk.msra.mxu2 %vm338_vm0, %v362_v1  ;;  %v332_v4 = vld [vmem:[%s1430_s16 + $0x10] sm:$0xff]  ;;  %v363_v5 = vld [vmem:[%s279_s26 + $0x18] sm:$0xff]  ;;  %345 = vst.msk [vmem:[#allocation3 + $0x8] sm:$0xff] %vm343_vm1, %v1291_v15  ;;  %vm477_vm2 = vcmask 64512   ;;  %v1292_v23 = vmov 0  }
  0x30   : > { %v335_v3 = vmul.f32 0.17677669, %v331_v2  ;;  %v333_v6 = vld [vmem:[%s1430_s16 + $0x18] sm:$0xff]  ;;  %v336_v7 = vmul.f32 0.17677669, %v332_v4  ;;  %991 = vmatpush.xpose.msk.msra.mxu3 %vm338_vm0, %v363_v5  ;;  %v360_v12 = vld [vmem:[%s279_s26] sm:$0xff]  ;;  %1086 = vset.pattern.permute.xlu0 %v1292_v23 }
  0x31   : > { %v337_v8 = vmul.f32 0.17677669, %v333_v6  ;;  %v330_v13 = vld [vmem:[%s1430_s16] sm:$0xff]  ;;  %985 = vmatpush.xpose.msk.msra.mxu0 %vm338_vm0, %v360_v12  ;;  %344 = vst.msk [vmem:[#allocation3] sm:$0xff] %vm343_vm1, %v1291_v15  ;;  %1084 = vset.pattern.permute.xlu1 %v1292_v23  ;;  %v1293_v24 = vmov 0.0   ;;  %s1490_s18 = scalar_lea.vmem [#allocation11], %s1426_s20 }
  0x32   : > { %340 = vst.msk [vmem:[#allocation2 + $0x8] sm:$0xff] %vm338_vm0, %v335_v3  ;;  %v334_v14 = vmul.f32 0.17677669, %v330_v13  ;;  %1085 = vset.pattern.permute.xlu2 %v1292_v23  ;;  %v367_v39 = vld [vmem:[%s1490_s18 + $0x18] sm:$0xff]  ;;  %v365_v40 = vld [vmem:[%s1490_s18 + $0x8] sm:$0xff]  ;;  %v366_v41 = vld [vmem:[%s1490_s18 + $0x10] sm:$0xff] }
  0x33   : > { %341 = vst.msk [vmem:[#allocation2 + $0x10] sm:$0xff] %vm338_vm0, %v336_v7  ;;  %608 = vmatpush.msrb.mxu1 %v365_v40  ;;  %631 = vmatpush.msrb.mxu2 %v366_v41  ;;  %v364_v12 = vld [vmem:[%s1490_s18] sm:$0xff]  ;;  %s1294_s24 = smov 64   ;;  %s1295_s29 = smov 32  }
  0x34   : > { %342 = vst.msk [vmem:[#allocation2 + $0x18] sm:$0xff] %vm338_vm0, %v337_v8  ;;  %654 = vmatpush.msrb.mxu3 %v367_v39  ;;  %s1296_s30 = smov 96   ;;  %s984_s4 = sshll.u32 %s1423_s1, 3 }
  0x35   : > { %339 = vst.msk [vmem:[#allocation2] sm:$0xff] %vm338_vm0, %v334_v14  ;;  %585 = vmatpush.msrb.mxu0 %v364_v12  ;;  %s998_s19 = sshll.u32 %s1279_s15, 3  ;;  %s322_s6 = scalar_lea.vmem [#allocation12], %s984_s4 }
  0x36   : > { %346 = vst.msk [vmem:[#allocation3 + $0x10] sm:$0xff] %vm343_vm1, %v1291_v15  ;;  %v1473_v25 = vld [vmem:[#allocation3 + $0x8] sm:$0xff]  ;;  %s821_s23 = scalar_lea.hbm %s1564_s3, %s998_s19  ;;  %s823_s7 = sshll.u32 %s322_s6, 4  ;;  %s824_s7 = int_to_ptr.vmem [resolvable:$true] %s823_s7 }
  0x37   : > { %347 = vst.msk [vmem:[#allocation3 + $0x18] sm:$0xff] %vm343_vm1, %v1291_v15  ;;  %s825_s8 = sshll.u32 %s821_s23, 4  ;;  %s809_s15 = scalar_lea.sflag [#allocation8], %s1423_s1  ;;  %s826_s8 = int_to_ptr.hbm [resolvable:$true] %s825_s8 }
  0x38   : > { %351 = vst.msk [vmem:[#allocation4 + $0x18] sm:$0xff] %vm343_vm1, %v1293_v24  ;;  %v473_v56 = vld [vmem:[#allocation3] sm:$0xff]  ;;  %s1215_s10 = sshra.s32 %s826_s8, 4  ;;  %s1221_s20 = scalar_lea.hbm %s1564_s3, 16  ;;  %s1216_s10 = int_to_ptr.hbm [resolvable:$true] %s1215_s10 }
  0x39   : > { %v357_v9 = vld [vmem:[#allocation2 + $0x8] sm:$0xff]  ;;  %348 = vst.msk [vmem:[#allocation4] sm:$0xff] %vm343_vm1, %v1293_v24  ;;  %s1217_s5 = scalar_lea.hbm %s1216_s10, 8  ;;  %p1222_p7 = scmp.lt.s32.totalorder %s1216_s10, %s1564_s3 }
  0x3a   : > { %988 = vmatmul.msk.f32.vlgmr.msra.gmra.mxu1 %vm338_vm0, %v357_v9  ;;  %v358_v10 = vld [vmem:[#allocation2 + $0x10] sm:$0xff]  ;;  %349 = vst.msk [vmem:[#allocation4 + $0x8] sm:$0xff] %vm343_vm1, %v1293_v24  ;;  %p1218_p4 = scmp.ne.s32.totalorder %s1216_s10, %s1217_s5  ;;  %p1223_p8 = scmp.lt.s32.totalorder %s1221_s20, %s1217_s5 }
  0x3b   : > { %990 = vmatmul.msk.f32.vlgmr.msra.gmra.mxu2 %vm338_vm0, %v358_v10  ;;  %v359_v11 = vld [vmem:[#allocation2 + $0x18] sm:$0xff]  ;;  %350 = vst.msk [vmem:[#allocation4 + $0x10] sm:$0xff] %vm343_vm1, %v1293_v24 }
  0x3c   : > { %992 = vmatmul.msk.f32.vlgmr.msra.gmra.mxu3 %vm338_vm0, %v359_v11  ;;  %v356_v16 = vld [vmem:[#allocation2] sm:$0xff]  ;;  %352 = vst.msk [vmem:[#allocation5] sm:$0xff] %vm338_vm0, %v1293_v24  ;;  %p1219_p5 = pnand %p1218_p4, %p1372_p9  ;;  %p1224_p10 = por %p1223_p8, %p1222_p7 }
  0x3d   : > { %986 = vmatmul.msk.f32.vlgmr.msra.gmra.mxu0 %vm338_vm0, %v356_v16  ;;  %353 = vst.msk [vmem:[#allocation5 + $0x8] sm:$0xff] %vm338_vm0, %v1293_v24  ;;  %v475_v29 = vld [vmem:[#allocation3 + $0x10] sm:$0xff] }
  0x3e   : > { %354 = vst.msk [vmem:[#allocation5 + $0x10] sm:$0xff] %vm338_vm0, %v1293_v24  ;;  %v476_v33 = vld [vmem:[#allocation3 + $0x18] sm:$0xff]  ;;  %p1220_p6 = pneg %p1219_p5 }
  0x3f   : > { %355 = vst.msk [vmem:[#allocation5 + $0x18] sm:$0xff] %vm338_vm0, %v1293_v24  ;;  %v541_v63 = vld [vmem:[#allocation4 + $0x18] sm:$0xff] }
  0x40   : > { %p1225_p13 = pnand %p1224_p10, %p1220_p6 }
  0x42   : > { %v540_v6 = vld [vmem:[#allocation4 + $0x10] sm:$0xff] }
  0xb7   : > { %v418_v17 = vpop.f32.mrf.mxu1 }
  0xb8   : > { %v481_v18 = vsel %vm477_vm2, %v418_v17, -inf }
  0xb9   : > { %482 = vmax.xlane.f32.xlu1 %v481_v18 }
  0xba   : > { %v1485_v37 = vpop.f32.mrf.mxu0 }
  0xbb   : > { %v478_v38 = vsel %vm477_vm2, %v1485_v37, -inf }
  0xbe   : > { %v444_v19 = vpop.f32.mrf.mxu2 }
  0xbf   : > { %v484_v20 = vsel %vm477_vm2, %v444_v19, -inf  ;;  %v470_v21 = vpop.f32.mrf.mxu3 }
  0xc0   : > { %485 = vmax.xlane.f32.xlu0 %v484_v20  ;;  %v487_v22 = vsel %vm477_vm2, %v470_v21, -inf }
  0xc8   : > { %488 = vmax.xlane.f32.xlu0 %v487_v22 }
 0x12c   : > { %v483_v26 = vpop.xlane.xlu1 %482 }
 0x12d   : > { %v1476_v27 = vmax.f32 %v1473_v25, %v483_v26 }
 0x12f   : > { %v495_v28 = vsub.f32 %v1473_v25, %v1476_v27  ;;  %696 = vst.msk [vmem:[#allocation3 + $0x8] sm:$0xff] %vm343_vm1, %v1476_v27  ;;  %513 = vperm.xlu0 %1086, %v1476_v27  }
 0x133   : > { %v486_v30 = vpop.xlane.xlu0 %485 }
 0x134   : > { %v492_v31 = vmax.f32 %v475_v29, %v486_v30 }
 0x136   : > { %v496_v32 = vsub.f32 %v475_v29, %v492_v31  ;;  %697 = vst.msk [vmem:[#allocation3 + $0x10] sm:$0xff] %vm343_vm1, %v492_v31  ;;  %518 = vperm.xlu1 %1084, %v492_v31   ;;  %v500_v31 = vmul.f32 1.442695, %v495_v28 }
 0x138   : > { %v502_v0 = vmul.f32 1.442695, %v496_v32 }
 0x13b   : > { %v489_v34 = vpop.xlane.xlu0 %488 }
 0x13c   : > { %v493_v35 = vmax.f32 %v476_v33, %v489_v34 }
 0x13e   : > { %v497_v36 = vsub.f32 %v476_v33, %v493_v35  ;;  %698 = vst.msk [vmem:[#allocation3 + $0x18] sm:$0xff] %vm343_vm1, %v493_v35  ;;  %523 = vperm.xlu2 %1085, %v493_v35   ;;  %v539_v33 = vld [vmem:[#allocation4 + $0x8] sm:$0xff] }
 0x140   : > { %v504_v61 = vmul.f32 1.442695, %v497_v36 }
 0x167   : > { %479 = vmax.xlane.f32.xlu2 %v478_v38 }
 0x198   : > { %v524_v42 = vpop.permute.xlu2 %523 }
 0x199   : > { %v529_v43 = vsub.f32 %v470_v21, %v524_v42 }
 0x19b   : > { %v536_v44 = vmul.f32 1.442695, %v529_v43  ;;  %v661_v43 = vld [vmem:[#allocation5 + $0x10] sm:$0xff] }
 0x19d   : > { %1087 = vpow2.f32 %v536_v44 }
 0x1a1   : > { %v514_v45 = vpop.permute.xlu0 %513 }
 0x1a2   : > { %v527_v46 = vsub.f32 %v418_v17, %v514_v45 }
 0x1a3   : > { %v1088_v47 = vpop.eup %1087 }
 0x1a4   : > { %v532_v48 = vmul.f32 1.442695, %v527_v46  ;;  %996 = vmatmul.msk.f32.vlgmr.msrb.gmra.mxu3 %vm477_vm2, %v1088_v47  ;;  %v555_v49 = vsel %vm477_vm2, %v1088_v47, 0.0 }
 0x1a5   : > { %556 = vadd.xlane.f32.xlu0 %v555_v49 }
 0x1a6   : > { %1089 = vpow2.f32 %v532_v48 }
 0x1a8   : > { %v519_v50 = vpop.permute.xlu1 %518 }
 0x1a9   : > { %v528_v51 = vsub.f32 %v444_v19, %v519_v50 }
 0x1ab   : > { %v534_v52 = vmul.f32 1.442695, %v528_v51 }
 0x1ac   : > { %v1090_v53 = vpop.eup %1089 }
 0x1ad   : > { %1091 = vpow2.f32 %v534_v52  ;;  %994 = vmatmul.msk.f32.vlgmr.msrb.gmra.mxu1 %vm477_vm2, %v1090_v53  ;;  %v549_v60 = vsel %vm477_vm2, %v1090_v53, 0.0 }
 0x1ae   : > { %1093 = vpow2.f32 %v504_v61 }
 0x1af   : > { %1095 = vpow2.f32 %v502_v0  ;;  %v538_v0 = vld [vmem:[#allocation4] sm:$0xff] }
 0x1b3   : > { %v1092_v54 = vpop.eup %1091 }
 0x1b4   : > { %995 = vmatmul.msk.f32.vlgmr.msrb.gmra.mxu2 %vm477_vm2, %v1092_v54  ;;  %v552_v55 = vsel %vm477_vm2, %v1092_v54, 0.0  ;;  %v1094_v62 = vpop.eup %1093 }
 0x1b5   : > { %553 = vadd.xlane.f32.xlu2 %v552_v55  ;;  %v545_v1 = vmul.f32 %v1094_v62, %v541_v63  ;;  %v1096_v5 = vpop.eup %1095 }
 0x1b6   : > { %v544_v8 = vmul.f32 %v1096_v5, %v540_v6  ;;  %v660_v6 = vld [vmem:[#allocation5 + $0x8] sm:$0xff] }
 0x1da   : > { %v480_v57 = vpop.xlane.xlu2 %479 }
 0x1db   : > { %v490_v58 = vmax.f32 %v473_v56, %v480_v57 }
 0x1dd   : > { %v494_v59 = vsub.f32 %v473_v56, %v490_v58  ;;  %695 = vst.msk [vmem:[#allocation3] sm:$0xff] %vm343_vm1, %v490_v58  ;;  %508 = vperm.xlu1 %1084, %v490_v58  }
 0x1df   : > { %v498_v4 = vmul.f32 1.442695, %v494_v59 }
 0x1e1   : > { %1097 = vpow2.f32 %v498_v4  ;;  %v659_v4 = vld [vmem:[#allocation5] sm:$0xff] }
 0x1e7   : > { %v1503_v7 = vpop.eup %1097 }
 0x207   : > { %550 = vadd.xlane.f32.xlu1 %v549_v60 }
 0x218   : > { %v557_v2 = vpop.xlane.xlu0 %556 }
 0x219   : > { %v561_v3 = vadd.f32 %v557_v2, %v545_v1  ;;  %v542_v1 = vmul.f32 %v1503_v7, %v538_v0 }
 0x21b   : > { %566 = vst.msk [vmem:[#allocation4 + $0x18] sm:$0xff] %vm343_vm1, %v561_v3 }
 0x220   : > { %675 = vperm.xlu1 %1084, %v1096_v5  }
 0x228   : > { %665 = vperm.xlu1 %1084, %v1503_v7   ;;  %v554_v9 = vpop.xlane.xlu2 %553  ;;  %v662_v7 = vld [vmem:[#allocation5 + $0x18] sm:$0xff] }
 0x229   : > { %v560_v10 = vadd.f32 %v554_v9, %v544_v8 }
 0x22a   : > { %v610_v12 = vpop.f32.mrf.mxu1 }
 0x22b   : > { %565 = vst.msk [vmem:[#allocation4 + $0x10] sm:$0xff] %vm343_vm1, %v560_v10 }
 0x232   : > { %v704_v11 = vld [vmem:[#allocation4 + $0x10] sm:$0xff] }
 0x233   : > { %1099 = vrcp.f32 %v704_v11  ;;  %v745_v16 = vand.u32 2147483648, %v704_v11  ;;  %v743_v18 = vand.u32 2147483647, %v704_v11  ;;  %vm739_vm4 = vweird.f32 %v704_v11 }
 0x235   : > { %v746_v20 = vor.u32 1.1754944e-38, %v745_v16  ;;  %vm744_vm6 = vcmp.eq.f32.partialorder %v743_v18, 8.507059e+37 }
 0x237   : > { %v633_v51 = vpop.f32.mrf.mxu2 }
 0x239   : > { %v1100_v13 = vpop.eup %1099 }
 0x23a   : > { %v735_v14 = vmul.f32 %v1100_v13, %v704_v11  ;;  %vm740_vm3 = vweird.f32 %v1100_v13 }
 0x23b   : > { %vm741_vm5 = vmor %vm739_vm4, %vm740_vm3  ;;  %vm803_vm4 = vcmask 523264  }
 0x23c   : > { %v736_v15 = vsub.f32 1.0, %v735_v14 }
 0x23e   : > { %v737_v17 = vmul.f32 %v1100_v13, %v736_v15 }
 0x240   : > { %v738_v19 = vadd.f32 %v1100_v13, %v737_v17 }
 0x242   : > { %v742_v21 = vsel %vm741_vm5, %v1100_v13, %v738_v19  ;;  %v656_v19 = vpop.f32.mrf.mxu3  ;;  %vm805_vm5 = vcmask 785408  }
 0x243   : > { %v747_v22 = vsel %vm744_vm6, %v746_v20, %v742_v21 }
 0x244   : > { %778 = vperm.xlu0 %1086, %v747_v22  }
 0x24f   : > { %v509_v23 = vpop.permute.xlu1 %508 }
 0x250   : > { %v526_v24 = vsub.f32 %v1485_v37, %v509_v23  ;;  %v705_v37 = vld [vmem:[#allocation4 + $0x18] sm:$0xff] }
 0x251   : > { %v759_v56 = vand.u32 2147483648, %v705_v37  ;;  %vm753_vm12 = vweird.f32 %v705_v37  ;;  %v757_v57 = vand.u32 2147483647, %v705_v37 }
 0x252   : > { %v530_v26 = vmul.f32 1.442695, %v526_v24 }
 0x253   : > { %v760_v59 = vor.u32 1.1754944e-38, %v759_v56  ;;  %vm758_vm14 = vcmp.eq.f32.partialorder %v757_v57, 8.507059e+37 }
 0x254   : > { %1101 = vpow2.f32 %v530_v26 }
 0x255   : > { %1103 = vpow2.f32 %v500_v31 }
 0x256   : > { %1105 = vrcp.f32 %v705_v37 }
 0x25a   : > { %v1102_v29 = vpop.eup %1101 }
 0x25b   : > { %993 = vmatmul.msk.f32.vlgmr.msrb.gmra.mxu0 %vm477_vm2, %v1102_v29  ;;  %v546_v30 = vsel %vm477_vm2, %v1102_v29, 0.0  ;;  %v1104_v32 = vpop.eup %1103 }
 0x25c   : > { %547 = vadd.xlane.f32.xlu2 %v546_v30  ;;  %v543_v34 = vmul.f32 %v1104_v32, %v539_v33  ;;  %v1106_v39 = vpop.eup %1105 }
 0x25d   : > { %v749_v40 = vmul.f32 %v1106_v39, %v705_v37  ;;  %vm754_vm11 = vweird.f32 %v1106_v39 }
 0x25e   : > { %vm755_vm13 = vmor %vm753_vm12, %vm754_vm11 }
 0x25f   : > { %v750_v27 = vsub.f32 1.0, %v749_v40 }
 0x261   : > { %v751_v48 = vmul.f32 %v1106_v39, %v750_v27 }
 0x263   : > { %v752_v55 = vadd.f32 %v1106_v39, %v751_v48 }
 0x265   : > { %v756_v58 = vsel %vm755_vm13, %v1106_v39, %v752_v55 }
 0x266   : > { %v761_v60 = vsel %vm758_vm14, %v760_v59, %v756_v58 }
 0x274   : > { %670 = vperm.xlu2 %1085, %v1104_v32  }
 0x27a   : > { %v551_v35 = vpop.xlane.xlu1 %550 }
 0x27b   : > { %v559_v36 = vadd.f32 %v551_v35, %v543_v34 }
 0x27c   : > { %680 = vperm.xlu2 %1085, %v1094_v62  }
 0x27d   : > { %564 = vst.msk [vmem:[#allocation4 + $0x8] sm:$0xff] %vm343_vm1, %v559_v36 }
 0x284   : > { %v703_v38 = vld [vmem:[#allocation4 + $0x8] sm:$0xff] }
 0x285   : > { %1107 = vrcp.f32 %v703_v38  ;;  %v731_v28 = vand.u32 2147483648, %v703_v38  ;;  %v729_v45 = vand.u32 2147483647, %v703_v38  ;;  %vm725_vm8 = vweird.f32 %v703_v38 }
 0x287   : > { %v732_v50 = vor.u32 1.1754944e-38, %v731_v28  ;;  %vm730_vm10 = vcmp.eq.f32.partialorder %v729_v45, 8.507059e+37 }
 0x28b   : > { %v1108_v41 = vpop.eup %1107 }
 0x28c   : > { %v721_v42 = vmul.f32 %v1108_v41, %v703_v38  ;;  %vm726_vm7 = vweird.f32 %v1108_v41 }
 0x28d   : > { %vm727_vm9 = vmor %vm725_vm8, %vm726_vm7 }
 0x28e   : > { %v722_v25 = vsub.f32 1.0, %v721_v42 }
 0x290   : > { %v723_v44 = vmul.f32 %v1108_v41, %v722_v25 }
 0x292   : > { %v676_v46 = vpop.permute.xlu1 %675  ;;  %v724_v47 = vadd.f32 %v1108_v41, %v723_v44 }
 0x293   : > { %v685_v49 = vmul.f32 %v676_v46, %v661_v43 }
 0x294   : > { %v728_v52 = vsel %vm727_vm9, %v1108_v41, %v724_v47 }
 0x295   : > { %v689_v53 = vadd.f32 %v685_v49, %v633_v51  ;;  %v733_v54 = vsel %vm730_vm10, %v732_v50, %v728_v52 }
 0x296   : > { %773 = vperm.xlu2 %1085, %v733_v54  }
 0x297   : > { %693 = vst.msk [vmem:[#allocation5 + $0x10] sm:$0xff] %vm338_vm0, %v689_v53 }
 0x29a   : > { %v666_v5 = vpop.permute.xlu1 %665 }
 0x29b   : > { %v683_v8 = vmul.f32 %v666_v5, %v659_v4 }
 0x29e   : > { %783 = vperm.xlu2 %1085, %v761_v60   ;;  %v764_v61 = vld [vmem:[#allocation5 + $0x10] sm:$0xff] }
 0x2b6   : > { %v779_v62 = vpop.permute.xlu0 %778 }
 0x2b7   : > { %v788_v63 = vmul.f32 %v779_v62, %v764_v61 }
 0x2b9   : > { %795 = vrot.lane.b32.xlu0 %v788_v63, %s1294_s24 }
 0x2cf   : > { %v548_v2 = vpop.xlane.xlu2 %547 }
 0x2d0   : > { %v558_v3 = vadd.f32 %v548_v2, %v542_v1 }
 0x2d2   : > { %563 = vst.msk [vmem:[#allocation4] sm:$0xff] %vm343_vm1, %v558_v3 }
 0x2d7   : > { %v671_v9 = vpop.permute.xlu2 %670 }
 0x2d8   : > { %v684_v10 = vmul.f32 %v671_v9, %v660_v6  ;;  %v587_v11 = vpop.f32.mrf.mxu0 }
 0x2d9   : > { %v687_v13 = vadd.f32 %v683_v8, %v587_v11  ;;  %v702_v14 = vld [vmem:[#allocation4] sm:$0xff] }
 0x2da   : > { %v688_v15 = vadd.f32 %v684_v10, %v610_v12  ;;  %1109 = vrcp.f32 %v702_v14  ;;  %v717_v23 = vand.u32 2147483648, %v702_v14  ;;  %v715_v26 = vand.u32 2147483647, %v702_v14 }
 0x2db   : > { %691 = vst.msk [vmem:[#allocation5] sm:$0xff] %vm338_vm0, %v687_v13  ;;  %vm711_vm1 = vweird.f32 %v702_v14 }
 0x2dc   : > { %692 = vst.msk [vmem:[#allocation5 + $0x8] sm:$0xff] %vm338_vm0, %v688_v15  ;;  %v718_v30 = vor.u32 1.1754944e-38, %v717_v23  ;;  %vm716_vm3 = vcmp.eq.f32.partialorder %v715_v26, 8.507059e+37 }
 0x2df   : > { %v681_v16 = vpop.permute.xlu2 %680 }
 0x2e0   : > { %v1110_v17 = vpop.eup %1109  ;;  %v686_v18 = vmul.f32 %v681_v16, %v662_v7 }
 0x2e1   : > { %v707_v20 = vmul.f32 %v1110_v17, %v702_v14  ;;  %vm712_vm15 = vweird.f32 %v1110_v17 }
 0x2e2   : > { %v690_v21 = vadd.f32 %v686_v18, %v656_v19  ;;  %vm713_vm2 = vmor %vm711_vm1, %vm712_vm15  ;;  %v762_v40 = vld [vmem:[#allocation5] sm:$0xff] }
 0x2e3   : > { %v708_v22 = vsub.f32 1.0, %v707_v20  ;;  %v763_v33 = vld [vmem:[#allocation5 + $0x8] sm:$0xff] }
 0x2e4   : > { %694 = vst.msk [vmem:[#allocation5 + $0x18] sm:$0xff] %vm338_vm0, %v690_v21 }
 0x2e5   : > { %v709_v24 = vmul.f32 %v1110_v17, %v708_v22 }
 0x2e7   : > { %v710_v29 = vadd.f32 %v1110_v17, %v709_v24 }
 0x2e9   : > { %v714_v31 = vsel %vm713_vm2, %v1110_v17, %v710_v29 }
 0x2ea   : > { %v719_v32 = vsel %vm716_vm3, %v718_v30, %v714_v31 }
 0x2eb   : > { %768 = vperm.xlu2 %1085, %v719_v32   ;;  %v765_v36 = vld [vmem:[#allocation5 + $0x18] sm:$0xff] }
 0x2f0   : > { %v774_v34 = vpop.permute.xlu2 %773 }
 0x2f1   : > { %v787_v35 = vmul.f32 %v774_v34, %v763_v33 }
 0x2f3   : > { %791 = vrot.lane.b32.xlu1 %v787_v35, %s1295_s29 }
 0x2f8   : > { %v784_v37 = vpop.permute.xlu2 %783 }
 0x2f9   : > { %v789_v38 = vmul.f32 %v784_v37, %v765_v36 }
 0x2fb   : > { %799 = vrot.lane.b32.xlu2 %v789_v38, %s1296_s30 }
 0x32b   : > { %v796_v25 = vpop.permute.xlu0 %795 }
 0x345   : > { %v769_v39 = vpop.permute.xlu2 %768 }
 0x346   : > { %v786_v41 = vmul.f32 %v769_v39, %v762_v40 }
 0x355   : > { %v800_v28 = vpop.permute.xlu2 %799 }
 0x365   : > { %v792_v42 = vpop.permute.xlu1 %791 }
 0x366   : > { %v802_v27 = vsel %vm338_vm0, %v786_v41, %v792_v42 }
 0x367   : > { %v804_v43 = vsel %vm803_vm4, %v802_v27, %v796_v25 }
 0x368   : > { %v806_v44 = vsel %vm805_vm5, %v804_v43, %v800_v28 }
 0x369   : > { %807 = vst [vmem:[%s322_s6] sm:$0xff] %v806_v44 }
 0x36a   : > { %1228 = shalt.err (!%p1225_p13)
}
 0x36b   : > { %1010 = dma.vmem_to_hbm [thread:$0]  (%p1372_p9), %s824_s7, 128, %s826_s8, %s809_s15  }
 0x36c PF: > { %s1583_s1 = sld [smem:[#allocation18_spill]]  ;;  %s837_s14 = sand.u32 1, %s1267_s12  }
 0x36d   : > { %p1023_p0 = pnand %p970_p12, %p1379_p11  ;;  %s838_s17 = scalar_lea.sflag [#allocation8], %s837_s14 }
 0x36f   : > { %p1024_p1 = pneg %p1023_p0 }
 0x371   : > { %1262 = dma.done.wait (%p1024_p1), %s838_s17, 128  }
 0x372   : > { %1264 = vsyncadd (%p1024_p1), %s838_s17, 4294967168  ;;  %s22_s17 = sadd.s32 1, %s1583_s1   ;;  %s1584_s26 = sld [smem:[#allocation16_spill]] }
 0x373   : > { %p19_p2 = scmp.ge.s32.totalorder %s22_s17, 4   ;;  %s1585_s14 = sld [smem:[#allocation20_spill]] }
 0x374   : > { %s1586_s15 = sld [smem:[#allocation17_spill]]  ;;  %s1588_s12 = smov %s1271_s13 }
 0x375   : > { %s1587_s16 = sld [smem:[#allocation19_spill]]  ;;  %21 = sbr.rel (!%p19_p2) target bundleno = 10 (0xa), region = 109 }
 0x378   : > { %s1589_s13 = smov %s1584_s26 }
 0x37a   :  { %844 = vsyncpa [#allocation7], 1 }
 0x37b   :  { %846 = vsyncpa [#allocation7 + $0x1], 1 }
 0x37c   :  { %847 = vsyncpa [#allocation10], 1 }
 0x37d   :  { %849 = vsyncpa [#allocation10 + $0x1], 1 }
 0x37e   :  { %850 = vsyncpa [#allocation8], 1 }
 0x37f   :  { %852 = vsyncpa [#allocation8 + $0x1], 1 }

</bundles_post_ra>
